<compile_context>
chip_gen: v7x
topology: tpu7x:2x2x1
jax: 0.10.0
libtpu: 0.0.40
codegen_flags: <defaults>
</compile_context>

<pallas_src>
import jax
import jax.numpy as jnp
from jax.experimental import pallas as pl
from jax.experimental.pallas import tpu as pltpu


def _round_up(x, m):
    return (x + m - 1) // m * m


def _cdiv(a, b):
    return -(-a // b)


def ffnn_kernel(x_ref, w1_ref, b1_ref, w2_ref, b2_ref, o_ref):
    # x : (TB, D_in_p)    f32  (cast to bf16 here, on the VPU)
    # w1: (D_in_p, H_p)   bf16     b1: (1, H_p)      f32
    # w2: (H_p, D_out_p)  bf16     b2: (1, D_out_p)  f32
    # o : (TB, D_out_p)   bf16 (or f32 if requested)
    x_bf16 = x_ref[...].astype(jnp.bfloat16)
    h = jnp.dot(x_bf16, w1_ref[...], preferred_element_type=jnp.float32)
    h = jnp.maximum(h + b1_ref[...], 0.0)          # bias + ReLU in f32 (v5e-safe)
    # TODO(synk): nn.Dropout is identity in eval mode; training-mode dropout
    # (pltpu.prng_random_bits mask) is not reproduced here.
    z = jnp.dot(h.astype(jnp.bfloat16), w2_ref[...],
                preferred_element_type=jnp.float32) + b2_ref[...]
    o_ref[...] = jax.nn.sigmoid(z).astype(o_ref.dtype)   # sigmoid in f32 (EUP)


def prepare_ffnn_params(w1, b1, w2, b2):
    """Pad fc1/fc2 parameters to TPU-friendly shapes ONCE at init time.

    Weights are zero-padded to multiples of 128 in every feature dim (inert)
    and cast to bf16 (MXU operand dtype, half the DMA bytes); biases stay f32.
    Returns a dict consumed by ffnn_forward; doing this at init time removes
    per-call HBM read+write passes over the weights.
    """
    d_in, hidden = w1.shape
    d_out = w2.shape[1]
    d_in_p = _round_up(d_in, 128)
    h_p = _round_up(hidden, 128)
    d_out_p = _round_up(d_out, 128)

    w1_p = (jnp.zeros((d_in_p, h_p), jnp.float32)
            .at[:d_in, :hidden].set(w1.astype(jnp.float32))
            .astype(jnp.bfloat16))
    b1_p = (jnp.zeros((1, h_p), jnp.float32)
            .at[:, :hidden].set(jnp.reshape(b1, (1, hidden)).astype(jnp.float32)))
    w2_p = (jnp.zeros((h_p, d_out_p), jnp.float32)
            .at[:hidden, :d_out].set(w2.astype(jnp.float32))
            .astype(jnp.bfloat16))
    b2_p = (jnp.zeros((1, d_out_p), jnp.float32)
            .at[:, :d_out].set(jnp.reshape(b2, (1, d_out)).astype(jnp.float32)))

    return {"w1": w1_p, "b1": b1_p, "w2": w2_p, "b2": b2_p,
            "d_in": d_in, "d_out": d_out}


def ffnn_forward(x, params, *, batch_tile=512, out_dtype=jnp.bfloat16):
    """sigmoid(relu(flatten(x) @ w1 + b1) @ w2 + b2), dropout = identity (eval).

    x      : (N, ...) -- flattened to (N, d_in) like HL.flatten_input_data.
    params : output of prepare_ffnn_params (padded bf16 weights, f32 biases).
    """
    w1_p, b1_p = params["w1"], params["b1"]
    w2_p, b2_p = params["w2"], params["b2"]
    d_in, d_out = params["d_in"], params["d_out"]
    d_in_p, h_p = w1_p.shape
    d_out_p = w2_p.shape[1]

    n = x.shape[0]
    x2d = jnp.reshape(x, (n, -1)).astype(jnp.float32)   # flatten_input_data
    assert x2d.shape[1] == d_in, (x2d.shape, d_in)

    # ---- Batch tiling -------------------------------------------------------
    # tb multiple of 16 (bf16 sublane packing of the output tile); grid gets
    # >=2 steps whenever there is enough batch so v7x's two TCs both get work.
    n_min = _round_up(n, 16)
    ntiles = max(1, _cdiv(n_min, batch_tile))
    if ntiles == 1 and n_min >= 32:
        ntiles = 2
    tb = _round_up(_cdiv(n_min, ntiles), 16)
    n_p = ntiles * tb
    grid = (ntiles,)

    # Pad x only when strictly needed (unaligned batch or ragged d_in); for the
    # common d_in%128==0, batch-aligned case x goes straight to the kernel.
    if n_p != n or d_in_p != d_in:
        x_in = jnp.zeros((n_p, d_in_p), jnp.float32).at[:n, :d_in].set(x2d)
    else:
        x_in = x2d

    out_itemsize = jnp.dtype(out_dtype).itemsize

    # ---- Explicit VMEM budget (v5e default scoped limit is only 16 MiB). ----
    weight_bytes = (w1_p.size + w2_p.size) * 2 + (b1_p.size + b2_p.size) * 4
    io_bytes = 2 * tb * d_in_p * 4 + 2 * tb * d_out_p * out_itemsize  # dbl-buffered tiles
    interm_bytes = tb * (d_in_p * 2 + h_p * (4 + 2) + d_out_p * 4)
    vmem_limit = int(min(56 * 1024 * 1024,                   # < v7x 64 MiB physical
                         max(32 * 1024 * 1024,
                             2 * (weight_bytes + io_bytes + interm_bytes))))

    flops = 2 * n_p * (d_in_p * h_p + h_p * d_out_p)
    bytes_accessed = n_p * d_in_p * 4 + weight_bytes + n_p * d_out_p * out_itemsize
    cost = pl.CostEstimate(flops=flops,
                           transcendentals=n_p * d_out_p,
                           bytes_accessed=bytes_accessed)

    # Weights/biases: constant index_map (VMEM-resident across grid steps) and
    # single-buffered -- no point double-buffering data that never changes.
    resident = dict(pipeline_mode=pl.Buffered(1))

    out = pl.pallas_call(
        ffnn_kernel,
        out_shape=jax.ShapeDtypeStruct((n_p, d_out_p), out_dtype),
        grid=grid,
        in_specs=[
            pl.BlockSpec((tb, d_in_p), lambda i: (i, 0)),                # x: batch-tiled
            pl.BlockSpec((d_in_p, h_p), lambda i: (0, 0), **resident),   # w1
            pl.BlockSpec((1, h_p), lambda i: (0, 0), **resident),        # b1
            pl.BlockSpec((h_p, d_out_p), lambda i: (0, 0), **resident),  # w2
            pl.BlockSpec((1, d_out_p), lambda i: (0, 0), **resident),    # b2
        ],
        out_specs=pl.BlockSpec((tb, d_out_p), lambda i: (i, 0)),
        compiler_params=pltpu.CompilerParams(
            dimension_semantics=("parallel",),
            vmem_limit_bytes=vmem_limit,
        ),
        cost_estimate=cost,
    )(x_in, w1_p, b1_p, w2_p, b2_p)

    return out[:n, :d_out]


def init_linear_params(key, in_features, out_features):
    """Deterministic init mimicking nn.Linear: U(-1/sqrt(fan_in), 1/sqrt(fan_in)).
    Returned weight is (in_features, out_features) (already transposed for x @ W)."""
    k_w, k_b = jax.random.split(key)
    bound = 1.0 / jnp.sqrt(jnp.float32(in_features))
    w = jax.random.uniform(
        k_w, (in_features, out_features), jnp.float32, -bound, bound
    )
    b = jax.random.uniform(k_b, (1, out_features), jnp.float32, -bound, bound)
    return w, b


if __name__ == "__main__":
    key = jax.random.PRNGKey(0)
    k_x, k_fc1, k_fc2 = jax.random.split(key, 3)

    # Small shapes consistent with the module: NCHW input -> flattened input_dim.
    batch, c, hgt, wid = 2, 4, 16, 16
    input_dim = c * hgt * wid          # 1024
    hidden_width = 32
    output_dim = 4
    # dropout_rate is irrelevant in eval mode (identity)

    x = jax.random.normal(k_x, (batch, c, hgt, wid), jnp.float32)
    w1, b1 = init_linear_params(k_fc1, input_dim, hidden_width)
    w2, b2 = init_linear_params(k_fc2, hidden_width, output_dim)

    params = prepare_ffnn_params(w1, b1, w2, b2)   # padded bf16 weights, once
    out = ffnn_forward(x, params)
    out = jax.block_until_ready(out)

    # Reference check in plain f32 JAX (kernel uses bf16 matmul operands and a
    # bf16 output store, so allow bf16-level tolerance).
    x2d = x.reshape(batch, -1)
    ref = jax.nn.sigmoid(jnp.maximum(x2d @ w1 + b1, 0.0) @ w2 + b2)
    out_f32 = out.astype(jnp.float32)
    assert out.shape == (batch, output_dim)
    assert jnp.allclose(out_f32, ref, atol=2e-2, rtol=2e-2), \
        f"max abs err {jnp.max(jnp.abs(out_f32 - ref))}"

    print("KERNEL_OK")
</pallas_src>

<mosaic_0001>
module attributes {stable_mosaic.version = 11 : i64} {
  func.func @ffnn_kernel(%arg0: i32, %arg1: memref<16x1024xf32, #tpu.memory_space<vmem>>, %arg2: memref<1024x128xbf16, #tpu.memory_space<vmem>>, %arg3: memref<1x128xf32, #tpu.memory_space<vmem>>, %arg4: memref<128x128xbf16, #tpu.memory_space<vmem>>, %arg5: memref<1x128xf32, #tpu.memory_space<vmem>>, %arg6: memref<16x128xbf16, #tpu.memory_space<vmem>>) attributes {dimension_semantics = [#tpu.dimension_semantics<parallel>], iteration_bounds = array<i64: 1>, scalar_prefetch = 0 : i64, scratch_operands = 0 : i64, tpu.core_type = #tpu.core_type<tc>, window_params = [{transform_indices = @transform_0, window_bounds = array<i64: 16, 1024>}, {pipeline_mode = #tpu.pipeline_mode<synchronous>, transform_indices = @transform_1, window_bounds = array<i64: 1024, 128>}, {pipeline_mode = #tpu.pipeline_mode<synchronous>, transform_indices = @transform_2, window_bounds = array<i64: 1, 128>}, {pipeline_mode = #tpu.pipeline_mode<synchronous>, transform_indices = @transform_3, window_bounds = array<i64: 128, 128>}, {pipeline_mode = #tpu.pipeline_mode<synchronous>, transform_indices = @transform_4, window_bounds = array<i64: 1, 128>}, {transform_indices = @transform_5, window_bounds = array<i64: 16, 128>}]} {
    %c0 = arith.constant 0 : index
    %c0_0 = arith.constant 0 : index
    %0 = vector.load %arg1[%c0, %c0_0] : memref<16x1024xf32, #tpu.memory_space<vmem>>, vector<16x1024xf32>
    %1 = arith.truncf %0 : vector<16x1024xf32> to vector<16x1024xbf16>
    %c0_1 = arith.constant 0 : index
    %c0_2 = arith.constant 0 : index
    %2 = vector.load %arg2[%c0_1, %c0_2] : memref<1024x128xbf16, #tpu.memory_space<vmem>>, vector<1024x128xbf16>
    %cst = arith.constant dense<0.000000e+00> : vector<16x128xf32>
    %3 = tpu.matmul %1, %2, %cst {dimension_numbers = #tpu.dot_dimension_numbers<[1], [0], [0], [1], [0, 0, 1, 1], [], []>} : vector<16x1024xbf16>, vector<1024x128xbf16>, vector<16x128xf32> -> vector<16x128xf32>
    %c0_3 = arith.constant 0 : index
    %c0_4 = arith.constant 0 : index
    %4 = vector.load %arg3[%c0_3, %c0_4] : memref<1x128xf32, #tpu.memory_space<vmem>>, vector<1x128xf32>
    %5 = vector.broadcast %4 : vector<1x128xf32> to vector<16x128xf32>
    %6 = arith.addf %3, %5 : vector<16x128xf32>
    %cst_5 = arith.constant 0.000000e+00 : f32
    %7 = vector.broadcast %cst_5 : f32 to vector<16x128xf32>
    %8 = arith.maximumf %6, %7 : vector<16x128xf32>
    %9 = arith.truncf %8 : vector<16x128xf32> to vector<16x128xbf16>
    %c0_6 = arith.constant 0 : index
    %c0_7 = arith.constant 0 : index
    %10 = vector.load %arg4[%c0_6, %c0_7] : memref<128x128xbf16, #tpu.memory_space<vmem>>, vector<128x128xbf16>
    %cst_8 = arith.constant dense<0.000000e+00> : vector<16x128xf32>
    %11 = tpu.matmul %9, %10, %cst_8 {dimension_numbers = #tpu.dot_dimension_numbers<[1], [0], [0], [1], [0, 0, 1, 1], [], []>} : vector<16x128xbf16>, vector<128x128xbf16>, vector<16x128xf32> -> vector<16x128xf32>
    %c0_9 = arith.constant 0 : index
    %c0_10 = arith.constant 0 : index
    %12 = vector.load %arg5[%c0_9, %c0_10] : memref<1x128xf32, #tpu.memory_space<vmem>>, vector<1x128xf32>
    %13 = vector.broadcast %12 : vector<1x128xf32> to vector<16x128xf32>
    %14 = arith.addf %11, %13 : vector<16x128xf32>
    %15 = arith.negf %14 : vector<16x128xf32>
    %16 = math.exp %15 : vector<16x128xf32>
    %cst_11 = arith.constant 1.000000e+00 : f32
    %17 = vector.broadcast %cst_11 : f32 to vector<16x128xf32>
    %18 = arith.addf %17, %16 : vector<16x128xf32>
    %19 = arith.divf %17, %18 : vector<16x128xf32>
    %20 = arith.truncf %19 : vector<16x128xf32> to vector<16x128xbf16>
    %c0_12 = arith.constant 0 : index
    %c0_13 = arith.constant 0 : index
    %21 = vector.load %arg6[%c0_12, %c0_13] : memref<16x128xbf16, #tpu.memory_space<vmem>>, vector<16x128xbf16>
    tpu.vector_store %arg6[%c0_12, %c0_13], %20 {strides = array<i32>} : memref<16x128xbf16, #tpu.memory_space<vmem>>, vector<16x128xbf16>,
    return
  }
  func.func @transform_0(%arg0: i32) -> (i32, i32) {
    %c0_i32 = arith.constant 0 : i32
    %c0_i32_0 = arith.constant 0 : i32
    return %arg0, %c0_i32 : i32, i32
  }
  func.func @transform_1(%arg0: i32) -> (i32, i32) {
    %c0_i32 = arith.constant 0 : i32
    %c0_i32_0 = arith.constant 0 : i32
    %c0_i32_1 = arith.constant 0 : i32
    return %c0_i32, %c0_i32_0 : i32, i32
  }
  func.func @transform_2(%arg0: i32) -> (i32, i32) {
    %c0_i32 = arith.constant 0 : i32
    %c0_i32_0 = arith.constant 0 : i32
    %c0_i32_1 = arith.constant 0 : i32
    return %c0_i32, %c0_i32_0 : i32, i32
  }
  func.func @transform_3(%arg0: i32) -> (i32, i32) {
    %c0_i32 = arith.constant 0 : i32
    %c0_i32_0 = arith.constant 0 : i32
    %c0_i32_1 = arith.constant 0 : i32
    return %c0_i32, %c0_i32_0 : i32, i32
  }
  func.func @transform_4(%arg0: i32) -> (i32, i32) {
    %c0_i32 = arith.constant 0 : i32
    %c0_i32_0 = arith.constant 0 : i32
    %c0_i32_1 = arith.constant 0 : i32
    return %c0_i32, %c0_i32_0 : i32, i32
  }
  func.func @transform_5(%arg0: i32) -> (i32, i32) {
    %c0_i32 = arith.constant 0 : i32
    %c0_i32_0 = arith.constant 0 : i32
    return %arg0, %c0_i32 : i32, i32
  }
}

</mosaic_0001>

<bundles_post_ra>
// kernel: tpu_custom_call.1
= control target key start
LH: loop header
LB: loop body
LE: loop exit
PB: predicated region body
PF: predicated region fallthrough
CT: control target
= control target key end

     0   :  { %10 = vsyncpa [#allocation3], 0  ;;  %s1413_s0 = inlined_call_operand.hbm [shape: f32[16,1024], index: 0, kind: input, shape index: {}]   ;;  %s1414_s1 = inlined_call_operand.hbm [shape: bf16[1024,128], index: 1, kind: input, shape index: {}]   ;;  %s1415_s2 = inlined_call_operand.vmem [shape: f32[1,128], index: 2, kind: input, shape index: {}]   ;;  %s1416_s3 = inlined_call_operand.hbm [shape: bf16[128,128], index: 3, kind: input, shape index: {}]   ;;  %s1417_s4 = inlined_call_operand.vmem [shape: f32[1,128], index: 4, kind: input, shape index: {}]   ;;  %s1418_s5 = inlined_call_operand.hbm [shape: bf16[16,128], index: 5, kind: output, shape index: {}]  }
   0x1   :  { %11 = vsyncpa [#allocation6], 0 }
   0x2   :  { %12 = vsyncpa [#allocation4], 0  ;;  %s1310_s18 = smov [#allocation5]   ;;  %s1216_s22 = scalar_lea.hbm %s1414_s1, 8192 }
   0x3   :  { %s30_s19 = sshll.u32 %s1310_s18, 4  ;;  %p1217_p0 = scmp.ne.s32.totalorder %s1414_s1, %s1216_s22  ;;  %s31_s19 = int_to_ptr.vmem [resolvable:$true] %s30_s19 }
   0x4   :  { %p1220_p1 = scmp.lt.u32.totalorder %s1216_s22, %s1414_s1 }
   0x6   :  { %p1222_p2 = pnand %p1220_p1, %p1217_p0 }
   0x8   :  { %1225 = shalt.err (!%p1222_p2)
}
   0x9   :  { %s1226_s27 = scalar_lea.vmem %s31_s19, 8192  ;;  %p1231_p4 = scmp.lt.s32.totalorder %s31_s19, %s31_s19 }
   0xa   :  { %p1227_p3 = scmp.ne.s32.totalorder %s31_s19, %s1226_s27  ;;  %p1232_p5 = scmp.lt.s32.totalorder %s1226_s27, %s1226_s27 }
   0xc   :  { %p1233_p6 = por %p1232_p5, %p1231_p4 }
   0xe   :  { %p1234_p7 = pnand %p1233_p6, %p1227_p3 }
  0x10   :  { %1237 = shalt.err (!%p1234_p7)
}
  0x11   :  { %s1311_s28 = smov 64   ;;  %s1312_s29 = smov 4  }
  0x12   :  { %36 = dma.hbm_to_vmem [thread:$0]  %s1414_s1, 8192, %s31_s19, [#allocation6], %s1311_s28, %s1311_s28, %s1312_s29  }
  0x13   :  { %s1313_s7 = smov [#allocation2]   ;;  %s1238_s11 = scalar_lea.hbm %s1413_s0, 2048 }
  0x14   :  { %s18_s8 = sshll.u32 %s1313_s7, 4  ;;  %p1239_p8 = scmp.ne.s32.totalorder %s1413_s0, %s1238_s11  ;;  %s19_s8 = int_to_ptr.vmem [resolvable:$true] %s18_s8 }
  0x15   :  { %p1242_p9 = scmp.lt.u32.totalorder %s1238_s11, %s1413_s0 }
  0x17   :  { %p1244_p10 = pnand %p1242_p9, %p1239_p8 }
  0x19   :  { %1247 = shalt.err (!%p1244_p10)
}
  0x1a   :  { %s1248_s16 = scalar_lea.vmem %s19_s8, 2048  ;;  %p1253_p12 = scmp.lt.s32.totalorder %s19_s8, %s19_s8 }
  0x1b   :  { %p1249_p11 = scmp.ne.s32.totalorder %s19_s8, %s1248_s16  ;;  %p1254_p13 = scmp.lt.s32.totalorder %s1248_s16, %s1248_s16 }
  0x1d   :  { %p1255_p0 = por %p1254_p13, %p1253_p12 }
  0x1f   :  { %p1256_p1 = pnand %p1255_p0, %p1249_p11 }
  0x21   :  { %1259 = shalt.err (!%p1256_p1)
}
  0x22   :  { %s1314_s1 = smov 1024   ;;  %s1315_s19 = smov [#allocation7]  }
  0x23   :  { %24 = dma.hbm_to_vmem [thread:$0]  %s1413_s0, 2048, %s19_s8, [#allocation3], %s1314_s1, %s1314_s1, %s1311_s28  }
  0x24   :  { %s44_s20 = sshll.u32 %s1315_s19, 4  ;;  %s1260_s23 = scalar_lea.hbm %s1416_s3, 1024  ;;  %s45_s20 = int_to_ptr.vmem [resolvable:$true] %s44_s20 }
  0x25   :  { %p1261_p2 = scmp.ne.s32.totalorder %s1416_s3, %s1260_s23  ;;  %p1264_p3 = scmp.lt.u32.totalorder %s1260_s23, %s1416_s3 }
  0x27   :  { %p1266_p4 = pnand %p1264_p3, %p1261_p2 }
  0x29   :  { %1269 = shalt.err (!%p1266_p4)
}
  0x2a   :  { %s1270_s30 = scalar_lea.vmem %s45_s20, 1024  ;;  %p1275_p6 = scmp.lt.s32.totalorder %s45_s20, %s45_s20 }
  0x2b   :  { %p1271_p5 = scmp.ne.s32.totalorder %s45_s20, %s1270_s30  ;;  %p1276_p7 = scmp.lt.s32.totalorder %s1270_s30, %s1270_s30 }
  0x2d   :  { %p1277_p8 = por %p1276_p7, %p1275_p6 }
  0x2f   :  { %p1278_p9 = pnand %p1277_p8, %p1271_p5 }
  0x31   :  { %1281 = shalt.err (!%p1278_p9)
}
  0x32   :  { %50 = dma.hbm_to_vmem [thread:$0]  %s1416_s3, 1024, %s45_s20, [#allocation6], %s1311_s28, %s1311_s28, %s1312_s29  }
  0x33   :  { %1304 = dma.done.wait [#allocation3], 2048  }
  0x34   :  { %1305 = vsyncadd [#allocation3], 4294965248 }
  0x35   :  { %1306 = dma.done.wait [#allocation6], 9216  }
  0x36   :  { %1307 = vsyncadd [#allocation6], 4294958080  ;;  %v1136_v0 = vld [vmem:[#allocation5 + $0x40] sm:$0xff]   ;;  %v1140_v4 = vld [vmem:[#allocation5 + $0x48] sm:$0xff]   ;;  %vm1317_vm0 = vmmov 0   ;;  %s1318_s9 = smov [#allocation8]  }
  0x37   :  { %v1137_v1 = vld [vmem:[#allocation5 + $0xc0] sm:$0xff]   ;;  %1010 = vmatprep.subr.bf16.mxu0 %v1136_v0  ;;  %v1141_v5 = vld [vmem:[#allocation5 + $0xc8] sm:$0xff]   ;;  %v1144_v8 = vld [vmem:[#allocation5 + $0x50] sm:$0xff]   ;;  %s912_s10 = sshll.u32 %s1318_s9, 4  ;;  %s913_s10 = int_to_ptr.vmem [resolvable:$true] %s912_s10 }
  0x38   :  { %v1138_v2 = vld [vmem:[#allocation5] sm:$0xff]   ;;  %1032 = vmatprep.subr.bf16.mxu1 %v1137_v1  ;;  %v1142_v6 = vld [vmem:[#allocation5 + $0x8] sm:$0xff]   ;;  %v1145_v9 = vld [vmem:[#allocation5 + $0xd0] sm:$0xff]   ;;  %p1287_p11 = scmp.lt.s32.totalorder %s913_s10, %s913_s10 }
  0x39   :  { %v1139_v3 = vld [vmem:[#allocation5 + $0x80] sm:$0xff]   ;;  %1011 = vmatpush3.bf16.msra.mxu0 %v1138_v2  ;;  %v1143_v7 = vld [vmem:[#allocation5 + $0x88] sm:$0xff]   ;;  %v1146_v10 = vld [vmem:[#allocation5 + $0x10] sm:$0xff]  }
  0x3a   :  { %1033 = vmatpush3.bf16.msra.mxu1 %v1139_v3  ;;  %1012 = vmatprep.subr.bf16.mxu0 %v1140_v4  ;;  %v1147_v11 = vld [vmem:[#allocation5 + $0x90] sm:$0xff]   ;;  %v1148_v12 = vld [vmem:[#allocation5 + $0x58] sm:$0xff]   ;;  %v1152_v16 = vld [vmem:[#allocation5 + $0x60] sm:$0xff]  }
  0x3b   :  { %1034 = vmatprep.subr.bf16.mxu1 %v1141_v5  ;;  %v1149_v13 = vld [vmem:[#allocation5 + $0xd8] sm:$0xff]   ;;  %v1153_v17 = vld [vmem:[#allocation5 + $0xe0] sm:$0xff]   ;;  %v1156_v20 = vld [vmem:[#allocation5 + $0x68] sm:$0xff]  }
  0x3c   :  { %v1150_v14 = vld [vmem:[#allocation5 + $0x18] sm:$0xff]   ;;  %v1154_v18 = vld [vmem:[#allocation5 + $0x20] sm:$0xff]   ;;  %v1157_v21 = vld [vmem:[#allocation5 + $0xe8] sm:$0xff]  }
  0x3d   :  { %1013 = vmatpush3.bf16.msra.mxu0 %v1142_v6  ;;  %v1151_v15 = vld [vmem:[#allocation5 + $0x98] sm:$0xff]   ;;  %v1155_v19 = vld [vmem:[#allocation5 + $0xa0] sm:$0xff]   ;;  %v1158_v22 = vld [vmem:[#allocation5 + $0x28] sm:$0xff]  }
  0x3e   :  { %1035 = vmatpush3.bf16.msra.mxu1 %v1143_v7  ;;  %1014 = vmatprep.subr.bf16.mxu0 %v1144_v8  ;;  %v1159_v23 = vld [vmem:[#allocation5 + $0xa8] sm:$0xff]   ;;  %v1160_v24 = vld [vmem:[#allocation5 + $0x70] sm:$0xff]   ;;  %v1164_v28 = vld [vmem:[#allocation5 + $0x78] sm:$0xff]  }
  0x3f   :  { %1036 = vmatprep.subr.bf16.mxu1 %v1145_v9  ;;  %v1161_v25 = vld [vmem:[#allocation5 + $0xf0] sm:$0xff]   ;;  %v1165_v29 = vld [vmem:[#allocation5 + $0xf8] sm:$0xff]   ;;  %v64_v32 = vld [vmem:[#allocation2 + $0x8] sm:$0xff] }
  0x40   :  { %v1162_v26 = vld [vmem:[#allocation5 + $0x30] sm:$0xff]   ;;  %v1166_v30 = vld [vmem:[#allocation5 + $0x38] sm:$0xff]   ;;  %v72_v33 = vld [vmem:[#allocation2 + $0x48] sm:$0xff] }
  0x41   :  { %1015 = vmatpush3.bf16.msra.mxu0 %v1146_v10  ;;  %v1163_v27 = vld [vmem:[#allocation5 + $0xb0] sm:$0xff]   ;;  %v1167_v31 = vld [vmem:[#allocation5 + $0xb8] sm:$0xff]   ;;  %v80_v35 = vpack.c.bf16 %v72_v33, %v64_v32  ;;  %v63_v37 = vld [vmem:[#allocation2] sm:$0xff] }
  0x42   :  { %1037 = vmatpush3.bf16.msra.mxu1 %v1147_v11  ;;  %1016 = vmatprep.subr.bf16.mxu0 %v1148_v12  ;;  %v66_v34 = vld [vmem:[#allocation2 + $0x18] sm:$0xff]  ;;  %v71_v38 = vld [vmem:[#allocation2 + $0x40] sm:$0xff]  ;;  %v65_v41 = vld [vmem:[#allocation2 + $0x10] sm:$0xff] }
  0x43   :  { %1038 = vmatprep.subr.bf16.mxu1 %v1149_v13  ;;  %v74_v36 = vld [vmem:[#allocation2 + $0x58] sm:$0xff]  ;;  %v79_v40 = vpack.c.bf16 %v71_v38, %v63_v37  ;;  %v73_v42 = vld [vmem:[#allocation2 + $0x50] sm:$0xff]  ;;  %638 = vmatprep.mubr.bf16.mxu0 %v80_v35  ;;  %v1168_v44 = vld [vmem:[#allocation5 + $0x140] sm:$0xff]  }
  0x44   :  { %v82_v39 = vpack.c.bf16 %v74_v36, %v66_v34  ;;  %v81_v43 = vpack.c.bf16 %v73_v42, %v65_v41  ;;  %v1169_v45 = vld [vmem:[#allocation5 + $0x1c0] sm:$0xff]   ;;  %v1172_v48 = vld [vmem:[#allocation5 + $0x148] sm:$0xff]   ;;  %v1176_v52 = vld [vmem:[#allocation5 + $0x150] sm:$0xff]  }
  0x45   :  { %1017 = vmatpush3.bf16.msra.mxu0 %v1150_v14  ;;  %v1170_v46 = vld [vmem:[#allocation5 + $0x100] sm:$0xff]   ;;  %v1173_v49 = vld [vmem:[#allocation5 + $0x1c8] sm:$0xff]   ;;  %v1177_v53 = vld [vmem:[#allocation5 + $0x1d0] sm:$0xff]  }
  0x46   :  { %1039 = vmatpush3.bf16.msra.mxu1 %v1151_v15  ;;  %1018 = vmatprep.subr.bf16.mxu0 %v1152_v16  ;;  %v1171_v47 = vld [vmem:[#allocation5 + $0x180] sm:$0xff]   ;;  %v1174_v50 = vld [vmem:[#allocation5 + $0x108] sm:$0xff]   ;;  %v1178_v54 = vld [vmem:[#allocation5 + $0x110] sm:$0xff]  }
  0x47   :  { %1040 = vmatprep.subr.bf16.mxu1 %v1153_v17  ;;  %679 = vmatprep.mubr.bf16.mxu1 %v82_v39  ;;  %v1175_v51 = vld [vmem:[#allocation5 + $0x188] sm:$0xff]   ;;  %v1179_v55 = vld [vmem:[#allocation5 + $0x190] sm:$0xff]   ;;  %v1180_v56 = vld [vmem:[#allocation5 + $0x158] sm:$0xff]  }
  0x48   :  { %v1181_v57 = vld [vmem:[#allocation5 + $0x1d8] sm:$0xff]   ;;  %v1184_v60 = vld [vmem:[#allocation5 + $0x160] sm:$0xff]   ;;  %v1188_v0 = vld [vmem:[#allocation5 + $0x168] sm:$0xff]  }
  0x49   :  { %1019 = vmatpush3.bf16.msra.mxu0 %v1154_v18  ;;  %v1182_v58 = vld [vmem:[#allocation5 + $0x118] sm:$0xff]   ;;  %v1185_v61 = vld [vmem:[#allocation5 + $0x1e0] sm:$0xff]   ;;  %v1189_v1 = vld [vmem:[#allocation5 + $0x1e8] sm:$0xff]  }
  0x4a   :  { %1041 = vmatpush3.bf16.msra.mxu1 %v1155_v19  ;;  %1020 = vmatprep.subr.bf16.mxu0 %v1156_v20  ;;  %v1183_v59 = vld [vmem:[#allocation5 + $0x198] sm:$0xff]   ;;  %v1186_v62 = vld [vmem:[#allocation5 + $0x120] sm:$0xff]   ;;  %v1190_v2 = vld [vmem:[#allocation5 + $0x128] sm:$0xff]  }
  0x4b   :  { %1042 = vmatprep.subr.bf16.mxu1 %v1157_v21  ;;  %v1187_v63 = vld [vmem:[#allocation5 + $0x1a0] sm:$0xff]   ;;  %v1191_v3 = vld [vmem:[#allocation5 + $0x1a8] sm:$0xff]   ;;  %v1192_v4 = vld [vmem:[#allocation5 + $0x170] sm:$0xff]  }
  0x4c   :  { %v1193_v5 = vld [vmem:[#allocation5 + $0x1f0] sm:$0xff]   ;;  %v1196_v8 = vld [vmem:[#allocation5 + $0x178] sm:$0xff]   ;;  %v68_v12 = vld [vmem:[#allocation2 + $0x28] sm:$0xff] }
  0x4d   :  { %1021 = vmatpush3.bf16.msra.mxu0 %v1158_v22  ;;  %v1194_v6 = vld [vmem:[#allocation5 + $0x130] sm:$0xff]   ;;  %v1197_v9 = vld [vmem:[#allocation5 + $0x1f8] sm:$0xff]   ;;  %v76_v13 = vld [vmem:[#allocation2 + $0x68] sm:$0xff] }
  0x4e   :  { %1043 = vmatpush3.bf16.msra.mxu1 %v1159_v23  ;;  %1022 = vmatprep.subr.bf16.mxu0 %v1160_v24  ;;  %v1195_v7 = vld [vmem:[#allocation5 + $0x1b0] sm:$0xff]   ;;  %v1198_v10 = vld [vmem:[#allocation5 + $0x138] sm:$0xff]   ;;  %v84_v16 = vpack.c.bf16 %v76_v13, %v68_v12  ;;  %v67_v18 = vld [vmem:[#allocation2 + $0x20] sm:$0xff] }
  0x4f   :  { %1044 = vmatprep.subr.bf16.mxu1 %v1161_v25  ;;  %v1199_v11 = vld [vmem:[#allocation5 + $0x1b8] sm:$0xff]   ;;  %v75_v19 = vld [vmem:[#allocation2 + $0x60] sm:$0xff]  ;;  %v69_v20 = vld [vmem:[#allocation2 + $0x30] sm:$0xff]  ;;  %v1316_v25 = vmov 0.0  }
  0x50   :  { %v70_v14 = vld [vmem:[#allocation2 + $0x38] sm:$0xff]  ;;  %v83_v21 = vpack.c.bf16 %v75_v19, %v67_v18  ;;  %v77_v22 = vld [vmem:[#allocation2 + $0x70] sm:$0xff]  ;;  %v1200_v24 = vld [vmem:[#allocation7] sm:$0xff]  }
  0x51   :  { %1023 = vmatpush3.bf16.msra.mxu0 %v1162_v26  ;;  %v78_v15 = vld [vmem:[#allocation2 + $0x78] sm:$0xff]  ;;  %v85_v23 = vpack.c.bf16 %v77_v22, %v69_v20  ;;  %v1201_v26 = vld [vmem:[#allocation7 + $0x8] sm:$0xff]   ;;  %v925_v35 = vld [vmem:[%s1415_s2] ss:$0 sm:$0xff] }
  0x52   :  { %1045 = vmatpush3.bf16.msra.mxu1 %v1163_v27  ;;  %1024 = vmatprep.subr.bf16.mxu0 %v1164_v28  ;;  %v86_v17 = vpack.c.bf16 %v78_v15, %v70_v14  ;;  %v1202_v27 = vld [vmem:[#allocation7 + $0x10] sm:$0xff]   ;;  %v1203_v28 = vld [vmem:[#allocation7 + $0x18] sm:$0xff]  }
  0x53   :  { %1046 = vmatprep.subr.bf16.mxu1 %v1165_v29  ;;  %v1204_v29 = vld [vmem:[#allocation7 + $0x20] sm:$0xff]   ;;  %v1207_v32 = vld [vmem:[#allocation7 + $0x38] sm:$0xff]  }
  0x55   :  { %1025 = vmatpush3.bf16.msra.mxu0 %v1166_v30  ;;  %v1205_v30 = vld [vmem:[#allocation7 + $0x28] sm:$0xff]  }
  0x56   :  { %1047 = vmatpush3.bf16.msra.mxu1 %v1167_v31  ;;  %1054 = vmatprep.subr.bf16.mxu0 %v1168_v44  ;;  %v1206_v31 = vld [vmem:[#allocation7 + $0x30] sm:$0xff]  }
  0x57   :  { %1076 = vmatprep.subr.bf16.mxu1 %v1169_v45 }
  0x58   :  { %639 = vmatmul.mubr.bf16.vlgmr.msra.gmra.mrb[0].mxu0 %v79_v40 }
  0x59   :  { %680 = vmatmul.mubr.bf16.vlgmr.msra.gmra.mrb[0].mxu1 %v81_v43  ;;  %1055 = vmatpush3.bf16.msra.mxu0 %v1170_v46 }
  0x5a   :  { %1077 = vmatpush3.bf16.msra.mxu1 %v1171_v47  ;;  %1056 = vmatprep.subr.bf16.mxu0 %v1172_v48 }
  0x5b   :  { %1078 = vmatprep.subr.bf16.mxu1 %v1173_v49  ;;  %720 = vmatprep.mubr.bf16.mxu0 %v84_v16 }
  0x5c   :  { %761 = vmatprep.mubr.bf16.mxu1 %v86_v17 }
  0x5d   :  { %1057 = vmatpush3.bf16.msra.mxu0 %v1174_v50 }
  0x5e   :  { %1079 = vmatpush3.bf16.msra.mxu1 %v1175_v51  ;;  %1058 = vmatprep.subr.bf16.mxu0 %v1176_v52 }
  0x5f   :  { %1080 = vmatprep.subr.bf16.mxu1 %v1177_v53 }
  0x61   :  { %1059 = vmatpush3.bf16.msra.mxu0 %v1178_v54 }
  0x62   :  { %1081 = vmatpush3.bf16.msra.mxu1 %v1179_v55  ;;  %1060 = vmatprep.subr.bf16.mxu0 %v1180_v56 }
  0x63   :  { %1082 = vmatprep.subr.bf16.mxu1 %v1181_v57 }
  0x65   :  { %1061 = vmatpush3.bf16.msra.mxu0 %v1182_v58 }
  0x66   :  { %1083 = vmatpush3.bf16.msra.mxu1 %v1183_v59  ;;  %1062 = vmatprep.subr.bf16.mxu0 %v1184_v60 }
  0x67   :  { %1084 = vmatprep.subr.bf16.mxu1 %v1185_v61 }
  0x69   :  { %1063 = vmatpush3.bf16.msra.mxu0 %v1186_v62 }
  0x6a   :  { %1085 = vmatpush3.bf16.msra.mxu1 %v1187_v63  ;;  %1064 = vmatprep.subr.bf16.mxu0 %v1188_v0 }
  0x6b   :  { %1086 = vmatprep.subr.bf16.mxu1 %v1189_v1 }
  0x6d   :  { %1065 = vmatpush3.bf16.msra.mxu0 %v1190_v2 }
  0x6e   :  { %1087 = vmatpush3.bf16.msra.mxu1 %v1191_v3  ;;  %1066 = vmatprep.subr.bf16.mxu0 %v1192_v4 }
  0x6f   :  { %1088 = vmatprep.subr.bf16.mxu1 %v1193_v5  ;;  %v990_v5 = vld [vmem:[%s1417_s4] ss:$0 sm:$0xff]  ;;  %s1282_s4 = scalar_lea.vmem %s913_s10, 128 }
  0x70   :  { %p1283_p10 = scmp.ne.s32.totalorder %s913_s10, %s1282_s4  ;;  %p1288_p12 = scmp.lt.s32.totalorder %s1282_s4, %s1282_s4 }
  0x71   :  { %1067 = vmatpush3.bf16.msra.mxu0 %v1194_v6 }
  0x72   :  { %1089 = vmatpush3.bf16.msra.mxu1 %v1195_v7  ;;  %1068 = vmatprep.subr.bf16.mxu0 %v1196_v8  ;;  %p1289_p13 = por %p1288_p12, %p1287_p11 }
  0x73   :  { %1090 = vmatprep.subr.bf16.mxu1 %v1197_v9 }
  0x74   :  { %p1290_p0 = pnand %p1289_p13, %p1283_p10 }
  0x75   :  { %1069 = vmatpush3.bf16.msra.mxu0 %v1198_v10 }
  0x76   :  { %1091 = vmatpush3.bf16.msra.mxu1 %v1199_v11  ;;  %1107 = vmatprep.subr.bf16.mxu0 %v1316_v25 }
  0x78   :  { %721 = vmatmul.mubr.bf16.vlgmr.msra.gmra.mrb[4].mxu0 %v83_v21 }
  0x79   :  { %762 = vmatmul.mubr.bf16.vlgmr.msra.gmra.mrb[4].mxu1 %v85_v23  ;;  %1108 = vmatpush3.bf16.msra.mxu0 %v1200_v24 }
  0x7a   :  { %1109 = vmatprep.subr.bf16.mxu0 %v1316_v25  ;;  %1123 = vmatprep.mubr.msk.bf16.mxu0 %vm1317_vm0, %v1316_v25 }
  0x7d   :  { %1110 = vmatpush3.bf16.msra.mxu0 %v1201_v26 }
  0x7e   :  { %1111 = vmatprep.subr.bf16.mxu0 %v1316_v25 }
  0x81   :  { %1112 = vmatpush3.bf16.msra.mxu0 %v1202_v27 }
  0x82   :  { %1113 = vmatprep.subr.bf16.mxu0 %v1316_v25 }
  0x85   :  { %1114 = vmatpush3.bf16.msra.mxu0 %v1203_v28 }
  0x86   :  { %1115 = vmatprep.subr.bf16.mxu0 %v1316_v25 }
  0x89   :  { %1116 = vmatpush3.bf16.msra.mxu0 %v1204_v29 }
  0x8a   :  { %1117 = vmatprep.subr.bf16.mxu0 %v1316_v25 }
  0x8d   :  { %1118 = vmatpush3.bf16.msra.mxu0 %v1205_v30 }
  0x8e   :  { %1119 = vmatprep.subr.bf16.mxu0 %v1316_v25 }
  0x91   :  { %1120 = vmatpush3.bf16.msra.mxu0 %v1206_v31 }
  0x92   :  { %1121 = vmatprep.subr.bf16.mxu0 %v1316_v25 }
  0x95   :  { %1122 = vmatpush3.bf16.msra.mxu0 %v1207_v32 }
 0x12b   :  { %v1026_v33 = vpop.f32.mrb[0].mxu0 }
 0x12c   :  { %v1048_v34 = vpop.f32.mrb[0].mxu1  ;;  %v1027_v36 = vpop.f32.mrb[1].mxu0 }
 0x12d   :  { %v1028_v37 = vadd.f32 %v1027_v36, %v1026_v33  ;;  %v1049_v38 = vpop.f32.mrb[1].mxu1  ;;  %v1029_v39 = vpop.f32.mrb[2].mxu0 }
 0x12e   :  { %v1050_v40 = vadd.f32 %v1049_v38, %v1048_v34  ;;  %v1051_v41 = vpop.f32.mrb[2].mxu1  ;;  %v1030_v42 = vpop.f32.mrb[3].mxu0 }
 0x12f   :  { %v641_v43 = vadd.f32 %v1028_v37, %v925_v35  ;;  %v1031_v44 = vadd.f32 %v1030_v42, %v1029_v39  ;;  %v1052_v45 = vpop.f32.mrb[3].mxu1 }
 0x130   :  { %v1053_v46 = vadd.f32 %v1052_v45, %v1051_v41 }
 0x131   :  { %v682_v47 = vadd.f32 %v1050_v40, %v641_v43  ;;  %v644_v48 = vadd.f32 %v1031_v44, %v925_v35 }
 0x133   :  { %v685_v49 = vadd.f32 %v1053_v46, %v644_v48 }
 0x14b   :  { %v1070_v50 = vpop.f32.mrb[4].mxu0 }
 0x14c   :  { %v1092_v51 = vpop.f32.mrb[4].mxu1  ;;  %v1071_v52 = vpop.f32.mrb[5].mxu0 }
 0x14d   :  { %v1072_v53 = vadd.f32 %v1071_v52, %v1070_v50  ;;  %v1093_v54 = vpop.f32.mrb[5].mxu1  ;;  %v1073_v55 = vpop.f32.mrb[6].mxu0 }
 0x14e   :  { %v1094_v56 = vadd.f32 %v1093_v54, %v1092_v51  ;;  %v1095_v57 = vpop.f32.mrb[6].mxu1  ;;  %v1074_v58 = vpop.f32.mrb[7].mxu0 }
 0x14f   :  { %v723_v59 = vadd.f32 %v1072_v53, %v682_v47  ;;  %v1075_v60 = vadd.f32 %v1074_v58, %v1073_v55  ;;  %v1096_v61 = vpop.f32.mrb[7].mxu1 }
 0x150   :  { %v1097_v62 = vadd.f32 %v1096_v61, %v1095_v57 }
 0x151   :  { %v764_v63 = vadd.f32 %v1094_v56, %v723_v59  ;;  %v726_v0 = vadd.f32 %v1075_v60, %v685_v49 }
 0x153   :  { %v767_v1 = vadd.f32 %v1097_v62, %v726_v0  ;;  %v770_v2 = vmax.f32 %v764_v63, 0.0 }
 0x155   :  { %v771_v3 = vmax.f32 %v767_v1, 0.0 }
 0x157   :  { %v772_v4 = vpack.c.bf16 %v771_v3, %v770_v2 }
 0x159   :  { %1124 = vmatmul.mubr.bf16.vlgmr.msra.gmra.mrb[8].mxu0 %v772_v4 }
 0x22c   :  { %v878_v6 = vpop.f32.mrb[8].mxu0 }
 0x22d   :  { %v879_v7 = vadd.f32 %v990_v5, %v878_v6  ;;  %v1125_v8 = vpop.f32.mrb[9].mxu0 }
 0x22e   :  { %v881_v9 = vpop.f32.mrb[10].mxu0 }
 0x22f   :  { %v999_v10 = vmul.f32 -1.442695, %v879_v7  ;;  %v882_v11 = vadd.f32 %v990_v5, %v881_v9  ;;  %v1126_v12 = vpop.f32.mrb[11].mxu0 }
 0x231   :  { %1208 = vpow2.f32 %v999_v10  ;;  %v1000_v13 = vmul.f32 -1.442695, %v882_v11 }
 0x233   :  { %1210 = vpow2.f32 %v1000_v13 }
 0x23b   :  { %v1209_v14 = vpop.eup %1208 }
 0x23c   :  { %v891_v15 = vadd.f32 1.0, %v1209_v14 }
 0x23d   :  { %v1211_v16 = vpop.eup %1210 }
 0x23e   :  { %v892_v17 = vadd.f32 1.0, %v1211_v16  ;;  %1212 = vrcp.f32 %v891_v15 }
 0x240   :  { %1214 = vrcp.f32 %v892_v17 }
 0x248   :  { %v1213_v18 = vpop.eup %1212 }
 0x24a   :  { %v1215_v19 = vpop.eup %1214 }
 0x24b   :  { %v1008_v20 = vpack.c.bf16 %v1215_v19, %v1213_v18 }
 0x24d   :  { %1009 = vst [vmem:[#allocation8] sm:$0xff] %v1008_v20  }
 0x24e   :  { %1293 = shalt.err (!%p1290_p0)
}
 0x24f   :  { %s1294_s13 = scalar_lea.hbm %s1418_s5, 128 }
 0x250   :  { %p1295_p1 = scmp.ne.s32.totalorder %s1418_s5, %s1294_s13  ;;  %p1298_p2 = scmp.lt.u32.totalorder %s1294_s13, %s1418_s5 }
 0x252   :  { %p1300_p3 = pnand %p1298_p2, %p1295_p1 }
 0x254   :  { %1303 = shalt.err (!%p1300_p3)
}
 0x255   :  { %918 = dma.vmem_to_hbm [thread:$0]  %s913_s10, 128, %s1418_s5, [#allocation4], %s1311_s28, %s1311_s28, %s1312_s29  }
 0x256   :  { %1308 = dma.done.wait [#allocation4], 128  }
 0x257   :  { %1309 = vsyncadd [#allocation4], 4294967168 }
 0x258   :  { %922 = vsyncpa [#allocation3], 1 }
 0x259   :  { %923 = vsyncpa [#allocation6], 1 }
 0x25a   :  { %924 = vsyncpa [#allocation4], 1 }

</bundles_post_ra>
